<compile_context>
chip_gen: v7x
topology: tpu7x:2x2x1
jax: 0.10.0
libtpu: 0.0.40
codegen_flags: <defaults>
</compile_context>

<pallas_src>
import jax
import jax.numpy as jnp
import numpy as np
from jax.experimental import pallas as pl
from jax.experimental.pallas import tpu as pltpu


def basic_block_kernel(x_ref, w1_ref, b1_ref, w2_ref, b2_ref, out_ref):
    # x_ref  : (Nb, H, W*C) bf16   lane-dense input rows for Nb batch elements
    # w*_ref : (3*W*C, W*C) bf16   fused banded block-Toeplitz conv weights
    #                              (BN scale and width zero padding folded in)
    # b*_ref : (1, W*C) f32        folded BN bias, tiled along W
    # out_ref: (Nb, H, W*C) f32
    Nb, H, WC = x_ref.shape
    M = Nb * H
    zblk = jnp.zeros((Nb, 1, WC), jnp.bfloat16)

    def conv3x3(rows, w_ref):
        # rows: (Nb, H, WC) bf16.  Height padding = per-batch 1-row shift with
        # zero fill (no cross-batch leakage); width padding and the BN scale
        # already live inside the Toeplitz weight.  Single K = 3*WC MXU dot.
        up = jnp.concatenate([zblk, rows[:, :H - 1]], axis=1)   # row h-1 (dh=0)
        dn = jnp.concatenate([rows[:, 1:], zblk], axis=1)       # row h+1 (dh=2)
        lhs = jnp.concatenate([up, rows, dn], axis=-1).reshape(M, 3 * WC)
        acc = jnp.dot(lhs, w_ref[...], preferred_element_type=jnp.float32)
        return acc.reshape(Nb, H, WC)                           # f32

    x = x_ref[...]                                              # bf16, no cast
    # conv1 + BN1 (scale folded into weights, bias here) + ReLU
    out1 = jnp.maximum(conv3x3(x, w1_ref) + b1_ref[...], 0.0)
    # conv2 + BN2 (one bf16 cast of the conv input)
    out2 = conv3x3(out1.astype(jnp.bfloat16), w2_ref) + b2_ref[...]
    # residual add (f32) + ReLU, lane-dense unmasked store
    out_ref[...] = jnp.maximum(out2 + x.astype(jnp.float32), 0.0).astype(out_ref.dtype)


def _fused_toeplitz_from_hwio(w_hwio, W):
    """w_hwio: (3, 3, Cin, Cout).  Returns the fused (3*W*Cin, W*Cout) banded
    block-Toeplitz matrix T such that  [up | mid | dn](M, 3*W*Cin) @ T applies
    a stride-1, padding-1 3x3 conv (width padding encoded as zero blocks).
    Row blocks 0..2 correspond to kernel rows dh = 0, 1, 2."""
    _, _, Ci, Co = w_hwio.shape
    Ts = []
    for dh in range(3):
        blk = jnp.zeros((W, W, Ci, Co), w_hwio.dtype)   # [w_in, w_out, ci, co]
        for dw in range(3):
            w_out = np.arange(max(0, 1 - dw), min(W, W + 1 - dw))
            w_in = w_out + dw - 1                       # 0 <= w_in < W
            blk = blk.at[w_in, w_out].set(w_hwio[dh, dw])
        Ts.append(blk.transpose(0, 2, 1, 3).reshape(W * Ci, W * Co))
    return jnp.stack(Ts).reshape(3 * W * Ci, W * Co)


def basic_block_lane_dense(x_lane_bf16, T1, bias1, T2, bias2, *, n_block=None):
    """x_lane_bf16: (N, H, W*C) bf16 lane-dense activations.  Returns f32 of
    the same shape.  n_block = batch elements per grid step (default: whole
    batch -> grid=(1,); on v7x use N//2 to occupy both TensorCores)."""
    N, H, WC = x_lane_bf16.shape
    nb = n_block if n_block is not None else N
    assert N % nb == 0

    flops = 2 * 2 * N * H * (3 * WC) * WC                     # two convs
    bytes_accessed = (N * H * WC * 2 + N * H * WC * 4         # x in, out
                      + 2 * 3 * WC * WC * 2 + 2 * WC * 4)     # weights, biases

    return pl.pallas_call(
        basic_block_kernel,
        out_shape=jax.ShapeDtypeStruct((N, H, WC), jnp.float32),
        grid_spec=pltpu.PrefetchScalarGridSpec(
            num_scalar_prefetch=0,
            grid=(N // nb,),
            in_specs=[
                pl.BlockSpec((nb, H, WC), lambda n: (n, 0, 0)),
                pl.BlockSpec((3 * WC, WC), lambda n: (0, 0)),
                pl.BlockSpec((1, WC), lambda n: (0, 0)),
                pl.BlockSpec((3 * WC, WC), lambda n: (0, 0)),
                pl.BlockSpec((1, WC), lambda n: (0, 0)),
            ],
            out_specs=pl.BlockSpec((nb, H, WC), lambda n: (n, 0, 0)),
        ),
        compiler_params=pltpu.CompilerParams(
            # Grid steps are independent batch chunks: shards across v7x's two
            # TensorCores when grid >= 2; neutral on single-TC v5e/v6e.
            dimension_semantics=("parallel",)),
        cost_estimate=pl.CostEstimate(flops=flops, transcendentals=0,
                                      bytes_accessed=bytes_accessed),
    )(x_lane_bf16, T1, bias1, T2, bias2)


def basic_block(x_nchw, w1, g1, b1, m1, v1, w2, g2, b2, m2, v2,
                eps=1e-5, n_block=None):
    """PyTorch-convention demo wrapper: x (N,C,H,W), conv weights (O,I,3,3),
    BN params (C,).  In a real network keep the lane-dense layout between
    blocks and call basic_block_lane_dense directly (the NCHW transposes here
    move more HBM bytes than the kernel at these sizes)."""
    N, Cin, H, W = x_nchw.shape
    Cout = w1.shape[0]
    assert Cin == Cout, "downsample is None -> inplanes must equal planes"
    WC = W * Cin

    # NCHW -> NHWC -> lane-dense (N, H, W*C), bf16 at the kernel boundary.
    x = jnp.transpose(x_nchw, (0, 2, 3, 1)).reshape(N, H, WC).astype(jnp.bfloat16)

    # OIHW -> HWIO
    w1_hwio = jnp.transpose(w1, (2, 3, 1, 0)).astype(jnp.float32)
    w2_hwio = jnp.transpose(w2, (2, 3, 1, 0)).astype(jnp.float32)

    # Fold BN (inference): scale into the conv weights (before the bf16 cast),
    # bias stays as a (1, W*C) add.
    inv1 = g1 / jnp.sqrt(v1 + eps)
    inv2 = g2 / jnp.sqrt(v2 + eps)
    w1_s = w1_hwio * inv1[None, None, None, :]
    w2_s = w2_hwio * inv2[None, None, None, :]
    bias1 = jnp.tile((b1 - m1 * inv1).astype(jnp.float32), W).reshape(1, WC)
    bias2 = jnp.tile((b2 - m2 * inv2).astype(jnp.float32), W).reshape(1, WC)

    # Fused banded block-Toeplitz weights, bf16 for the MXU (f32 accumulation).
    T1 = _fused_toeplitz_from_hwio(w1_s, W).astype(jnp.bfloat16)   # (3*WC, WC)
    T2 = _fused_toeplitz_from_hwio(w2_s, W).astype(jnp.bfloat16)

    out_flat = basic_block_lane_dense(x, T1, bias1, T2, bias2, n_block=n_block)

    # lane-dense -> NCHW (demo only)
    return jnp.transpose(out_flat.reshape(N, H, W, Cin), (0, 3, 1, 2))


def reference_nchw(x, w1, g1, b1, m1, v1, w2, g2, b2, m2, v2, eps=1e-5):
    dn = jax.lax.conv_dimension_numbers(x.shape, w1.shape,
                                        ('NCHW', 'OIHW', 'NCHW'))

    def bn(o, g, b, m, v):
        sh = (1, -1, 1, 1)
        return (o - m.reshape(sh)) / jnp.sqrt(v + eps).reshape(sh) \
            * g.reshape(sh) + b.reshape(sh)

    o = jax.lax.conv_general_dilated(x, w1, (1, 1), ((1, 1), (1, 1)),
                                     dimension_numbers=dn)
    o = jax.nn.relu(bn(o, g1, b1, m1, v1))
    o = jax.lax.conv_general_dilated(o, w2, (1, 1), ((1, 1), (1, 1)),
                                     dimension_numbers=dn)
    o = bn(o, g2, b2, m2, v2)
    return jax.nn.relu(o + x)


if __name__ == "__main__":
    key = jax.random.PRNGKey(0)
    N, C, H, W = 2, 8, 16, 16   # inplanes = planes = 8, W*C = 128 (lane-dense)

    ks = jax.random.split(key, 12)
    x = jax.random.normal(ks[0], (N, C, H, W), jnp.float32)
    w1 = 0.1 * jax.random.normal(ks[1], (C, C, 3, 3), jnp.float32)
    w2 = 0.1 * jax.random.normal(ks[2], (C, C, 3, 3), jnp.float32)
    g1 = 1.0 + 0.1 * jax.random.normal(ks[3], (C,), jnp.float32)
    b1 = 0.1 * jax.random.normal(ks[4], (C,), jnp.float32)
    m1 = 0.1 * jax.random.normal(ks[5], (C,), jnp.float32)
    v1 = jnp.abs(jax.random.normal(ks[6], (C,), jnp.float32)) + 0.5
    g2 = 1.0 + 0.1 * jax.random.normal(ks[7], (C,), jnp.float32)
    b2 = 0.1 * jax.random.normal(ks[8], (C,), jnp.float32)
    m2 = 0.1 * jax.random.normal(ks[9], (C,), jnp.float32)
    v2 = jnp.abs(jax.random.normal(ks[10], (C,), jnp.float32)) + 0.5

    out = basic_block(x, w1, g1, b1, m1, v1, w2, g2, b2, m2, v2)
    out = jax.block_until_ready(out)

    ref = reference_nchw(x, w1, g1, b1, m1, v1, w2, g2, b2, m2, v2)
    # bf16 activations/weights on the MXU with f32 accumulation -> ~1e-2 level.
    np.testing.assert_allclose(np.asarray(out), np.asarray(ref),
                               rtol=5e-2, atol=5e-2)
    print("KERNEL_OK")
</pallas_src>

<mosaic_0001>
module attributes {stable_mosaic.version = 11 : i64} {
  func.func @basic_block_kernel(%arg0: i32, %arg1: memref<2x16x128xbf16, #tpu.memory_space<vmem>>, %arg2: memref<384x128xbf16, #tpu.memory_space<vmem>>, %arg3: memref<1x128xf32, #tpu.memory_space<vmem>>, %arg4: memref<384x128xbf16, #tpu.memory_space<vmem>>, %arg5: memref<1x128xf32, #tpu.memory_space<vmem>>, %arg6: memref<2x16x128xf32, #tpu.memory_space<vmem>>) attributes {dimension_semantics = [#tpu.dimension_semantics<parallel>], iteration_bounds = array<i64: 1>, scalar_prefetch = 0 : i64, scratch_operands = 0 : i64, tpu.core_type = #tpu.core_type<tc>, window_params = [{transform_indices = @transform_0, window_bounds = array<i64: 2, 16, 128>}, {pipeline_mode = #tpu.pipeline_mode<synchronous>, transform_indices = @transform_1, window_bounds = array<i64: 384, 128>}, {pipeline_mode = #tpu.pipeline_mode<synchronous>, transform_indices = @transform_2, window_bounds = array<i64: 1, 128>}, {pipeline_mode = #tpu.pipeline_mode<synchronous>, transform_indices = @transform_3, window_bounds = array<i64: 384, 128>}, {pipeline_mode = #tpu.pipeline_mode<synchronous>, transform_indices = @transform_4, window_bounds = array<i64: 1, 128>}, {transform_indices = @transform_5, window_bounds = array<i64: 2, 16, 128>}]} {
    %cst = arith.constant 0.000000e+00 : bf16
    %0 = vector.broadcast %cst : bf16 to vector<2x1x128xbf16>
    %c0 = arith.constant 0 : index
    %c0_0 = arith.constant 0 : index
    %c0_1 = arith.constant 0 : index
    %1 = vector.load %arg1[%c0, %c0_0, %c0_1] : memref<2x16x128xbf16, #tpu.memory_space<vmem>>, vector<2x16x128xbf16>
    %2 = vector.extract_strided_slice %1 {offsets = [0, 0, 0], sizes = [2, 15, 128], strides = [1, 1, 1]} : vector<2x16x128xbf16> to vector<2x15x128xbf16>
    %3 = tpu.concatenate %0, %2 in 1 : vector<2x1x128xbf16>, vector<2x15x128xbf16> -> vector<2x16x128xbf16>
    %4 = vector.extract_strided_slice %1 {offsets = [0, 1, 0], sizes = [2, 15, 128], strides = [1, 1, 1]} : vector<2x16x128xbf16> to vector<2x15x128xbf16>
    %5 = tpu.concatenate %4, %0 in 1 : vector<2x15x128xbf16>, vector<2x1x128xbf16> -> vector<2x16x128xbf16>
    %6 = tpu.concatenate %3, %1, %5 in 2 : vector<2x16x128xbf16>, vector<2x16x128xbf16>, vector<2x16x128xbf16> -> vector<2x16x384xbf16>
    %7 = vector.shape_cast %6 : vector<2x16x384xbf16> to vector<32x384xbf16>
    %c0_2 = arith.constant 0 : index
    %c0_3 = arith.constant 0 : index
    %8 = vector.load %arg2[%c0_2, %c0_3] : memref<384x128xbf16, #tpu.memory_space<vmem>>, vector<384x128xbf16>
    %cst_4 = arith.constant dense<0.000000e+00> : vector<32x128xf32>
    %9 = tpu.matmul %7, %8, %cst_4 {dimension_numbers = #tpu.dot_dimension_numbers<[1], [0], [0], [1], [0, 0, 1, 1], [], []>} : vector<32x384xbf16>, vector<384x128xbf16>, vector<32x128xf32> -> vector<32x128xf32>
    %10 = vector.shape_cast %9 : vector<32x128xf32> to vector<2x16x128xf32>
    %c0_5 = arith.constant 0 : index
    %c0_6 = arith.constant 0 : index
    %11 = vector.load %arg3[%c0_5, %c0_6] : memref<1x128xf32, #tpu.memory_space<vmem>>, vector<1x128xf32>
    %12 = vector.shape_cast %11 : vector<1x128xf32> to vector<1x1x128xf32>
    %13 = vector.broadcast %12 : vector<1x1x128xf32> to vector<2x16x128xf32>
    %14 = arith.addf %10, %13 : vector<2x16x128xf32>
    %cst_7 = arith.constant 0.000000e+00 : f32
    %15 = vector.broadcast %cst_7 : f32 to vector<2x16x128xf32>
    %16 = arith.maximumf %14, %15 : vector<2x16x128xf32>
    %17 = arith.truncf %16 : vector<2x16x128xf32> to vector<2x16x128xbf16>
    %18 = vector.extract_strided_slice %17 {offsets = [0, 0, 0], sizes = [2, 15, 128], strides = [1, 1, 1]} : vector<2x16x128xbf16> to vector<2x15x128xbf16>
    %19 = tpu.concatenate %0, %18 in 1 : vector<2x1x128xbf16>, vector<2x15x128xbf16> -> vector<2x16x128xbf16>
    %20 = vector.extract_strided_slice %17 {offsets = [0, 1, 0], sizes = [2, 15, 128], strides = [1, 1, 1]} : vector<2x16x128xbf16> to vector<2x15x128xbf16>
    %21 = tpu.concatenate %20, %0 in 1 : vector<2x15x128xbf16>, vector<2x1x128xbf16> -> vector<2x16x128xbf16>
    %22 = tpu.concatenate %19, %17, %21 in 2 : vector<2x16x128xbf16>, vector<2x16x128xbf16>, vector<2x16x128xbf16> -> vector<2x16x384xbf16>
    %23 = vector.shape_cast %22 : vector<2x16x384xbf16> to vector<32x384xbf16>
    %c0_8 = arith.constant 0 : index
    %c0_9 = arith.constant 0 : index
    %24 = vector.load %arg4[%c0_8, %c0_9] : memref<384x128xbf16, #tpu.memory_space<vmem>>, vector<384x128xbf16>
    %cst_10 = arith.constant dense<0.000000e+00> : vector<32x128xf32>
    %25 = tpu.matmul %23, %24, %cst_10 {dimension_numbers = #tpu.dot_dimension_numbers<[1], [0], [0], [1], [0, 0, 1, 1], [], []>} : vector<32x384xbf16>, vector<384x128xbf16>, vector<32x128xf32> -> vector<32x128xf32>
    %26 = vector.shape_cast %25 : vector<32x128xf32> to vector<2x16x128xf32>
    %c0_11 = arith.constant 0 : index
    %c0_12 = arith.constant 0 : index
    %27 = vector.load %arg5[%c0_11, %c0_12] : memref<1x128xf32, #tpu.memory_space<vmem>>, vector<1x128xf32>
    %28 = vector.shape_cast %27 : vector<1x128xf32> to vector<1x1x128xf32>
    %29 = vector.broadcast %28 : vector<1x1x128xf32> to vector<2x16x128xf32>
    %30 = arith.addf %26, %29 : vector<2x16x128xf32>
    %31 = arith.extf %1 : vector<2x16x128xbf16> to vector<2x16x128xf32>
    %32 = arith.addf %30, %31 : vector<2x16x128xf32>
    %cst_13 = arith.constant 0.000000e+00 : f32
    %33 = vector.broadcast %cst_13 : f32 to vector<2x16x128xf32>
    %34 = arith.maximumf %32, %33 : vector<2x16x128xf32>
    %c0_14 = arith.constant 0 : index
    %c0_15 = arith.constant 0 : index
    %c0_16 = arith.constant 0 : index
    %35 = vector.load %arg6[%c0_14, %c0_15, %c0_16] : memref<2x16x128xf32, #tpu.memory_space<vmem>>, vector<2x16x128xf32>
    tpu.vector_store %arg6[%c0_14, %c0_15, %c0_16], %34 {strides = array<i32>} : memref<2x16x128xf32, #tpu.memory_space<vmem>>, vector<2x16x128xf32>,
    return
  }
  func.func @transform_0(%arg0: i32) -> (i32, i32, i32) {
    %c0_i32 = arith.constant 0 : i32
    %c0_i32_0 = arith.constant 0 : i32
    %c0_i32_1 = arith.constant 0 : i32
    return %arg0, %c0_i32, %c0_i32_0 : i32, i32, i32
  }
  func.func @transform_1(%arg0: i32) -> (i32, i32) {
    %c0_i32 = arith.constant 0 : i32
    %c0_i32_0 = arith.constant 0 : i32
    %c0_i32_1 = arith.constant 0 : i32
    return %c0_i32, %c0_i32_0 : i32, i32
  }
  func.func @transform_2(%arg0: i32) -> (i32, i32) {
    %c0_i32 = arith.constant 0 : i32
    %c0_i32_0 = arith.constant 0 : i32
    %c0_i32_1 = arith.constant 0 : i32
    return %c0_i32, %c0_i32_0 : i32, i32
  }
  func.func @transform_3(%arg0: i32) -> (i32, i32) {
    %c0_i32 = arith.constant 0 : i32
    %c0_i32_0 = arith.constant 0 : i32
    %c0_i32_1 = arith.constant 0 : i32
    return %c0_i32, %c0_i32_0 : i32, i32
  }
  func.func @transform_4(%arg0: i32) -> (i32, i32) {
    %c0_i32 = arith.constant 0 : i32
    %c0_i32_0 = arith.constant 0 : i32
    %c0_i32_1 = arith.constant 0 : i32
    return %c0_i32, %c0_i32_0 : i32, i32
  }
  func.func @transform_5(%arg0: i32) -> (i32, i32, i32) {
    %c0_i32 = arith.constant 0 : i32
    %c0_i32_0 = arith.constant 0 : i32
    %c0_i32_1 = arith.constant 0 : i32
    return %arg0, %c0_i32, %c0_i32_0 : i32, i32, i32
  }
}

</mosaic_0001>

<bundles_post_ra>
// kernel: tpu_custom_call.1
= control target key start
LH: loop header
LB: loop body
LE: loop exit
PB: predicated region body
PF: predicated region fallthrough
CT: control target
= control target key end

     0   :  { %10 = vsyncpa [#allocation3], 0  ;;  %s1248_s0 = inlined_call_operand.hbm [shape: bf16[2,16,128], index: 0, kind: input, shape index: {}]   ;;  %s1249_s1 = inlined_call_operand.hbm [shape: bf16[384,128], index: 1, kind: input, shape index: {}]   ;;  %s1250_s2 = inlined_call_operand.vmem [shape: f32[1,128], index: 2, kind: input, shape index: {}]   ;;  %s1251_s3 = inlined_call_operand.hbm [shape: bf16[384,128], index: 3, kind: input, shape index: {}]   ;;  %s1252_s4 = inlined_call_operand.vmem [shape: f32[1,128], index: 4, kind: input, shape index: {}]   ;;  %s1253_s5 = inlined_call_operand.hbm [shape: f32[2,16,128], index: 5, kind: output, shape index: {}]  }
   0x1   :  { %11 = vsyncpa [#allocation6], 0 }
   0x2   :  { %12 = vsyncpa [#allocation4], 0  ;;  %s1101_s18 = smov [#allocation5]   ;;  %s1102_s20 = smov [#allocation2]  }
   0x3   :  { %s30_s19 = sshll.u32 %s1101_s18, 4  ;;  %s18_s21 = sshll.u32 %s1102_s20, 4  ;;  %s31_s19 = int_to_ptr.vmem [resolvable:$true] %s30_s19  ;;  %s1139_s21 = int_to_ptr.vmem [resolvable:$true] %s18_s21 }
   0x4   :  { %s1007_s24 = scalar_lea.hbm %s1249_s1, 3072 }
   0x5   :  { %p1008_p0 = scmp.ne.s32.totalorder %s1249_s1, %s1007_s24  ;;  %p1011_p1 = scmp.lt.u32.totalorder %s1007_s24, %s1249_s1 }
   0x7   :  { %p1013_p2 = pnand %p1011_p1, %p1008_p0 }
   0x9   :  { %1016 = shalt.err (!%p1013_p2)
}
   0xa   :  { %s1017_s29 = scalar_lea.vmem %s31_s19, 3072  ;;  %p1022_p4 = scmp.lt.s32.totalorder %s31_s19, %s31_s19 }
   0xb   :  { %p1018_p3 = scmp.ne.s32.totalorder %s31_s19, %s1017_s29  ;;  %p1023_p5 = scmp.lt.s32.totalorder %s1017_s29, %s1017_s29 }
   0xd   :  { %p1024_p6 = por %p1023_p5, %p1022_p4 }
   0xf   :  { %p1025_p7 = pnand %p1024_p6, %p1018_p3 }
  0x11   :  { %1028 = shalt.err (!%p1025_p7)
}
  0x12   :  { %s1103_s30 = smov 64   ;;  %s1104_s6 = smov 4  }
  0x13   :  { %36 = dma.hbm_to_vmem [thread:$0]  %s1249_s1, 3072, %s31_s19, [#allocation6], %s1103_s30, %s1103_s30, %s1104_s6  }
  0x14   :  { %s1029_s11 = scalar_lea.hbm %s1248_s0, 256 }
  0x15   :  { %p1030_p8 = scmp.ne.s32.totalorder %s1248_s0, %s1029_s11  ;;  %p1033_p9 = scmp.lt.u32.totalorder %s1029_s11, %s1248_s0 }
  0x17   :  { %p1035_p10 = pnand %p1033_p9, %p1030_p8 }
  0x19   :  { %1038 = shalt.err (!%p1035_p10)
}
  0x1a   :  { %s1039_s16 = scalar_lea.vmem %s1139_s21, 256  ;;  %p1044_p12 = scmp.lt.s32.totalorder %s1139_s21, %s1139_s21 }
  0x1b   :  { %p1040_p11 = scmp.ne.s32.totalorder %s1139_s21, %s1039_s16  ;;  %p1045_p13 = scmp.lt.s32.totalorder %s1039_s16, %s1039_s16 }
  0x1d   :  { %p1046_p0 = por %p1045_p13, %p1044_p12 }
  0x1f   :  { %p1047_p1 = pnand %p1046_p0, %p1040_p11 }
  0x21   :  { %1050 = shalt.err (!%p1047_p1)
}
  0x22   :  { %24 = dma.hbm_to_vmem [thread:$0]  %s1248_s0, 256, %s1139_s21, [#allocation3], %s1103_s30, %s1103_s30, %s1104_s6  }
  0x23   :  { %s1105_s18 = smov [#allocation7]   ;;  %s1051_s23 = scalar_lea.hbm %s1251_s3, 3072 }
  0x24   :  { %s44_s19 = sshll.u32 %s1105_s18, 4  ;;  %p1052_p2 = scmp.ne.s32.totalorder %s1251_s3, %s1051_s23  ;;  %s45_s19 = int_to_ptr.vmem [resolvable:$true] %s44_s19 }
  0x25   :  { %p1055_p3 = scmp.lt.u32.totalorder %s1051_s23, %s1251_s3 }
  0x27   :  { %p1057_p4 = pnand %p1055_p3, %p1052_p2 }
  0x29   :  { %1060 = shalt.err (!%p1057_p4)
}
  0x2a   :  { %s1061_s28 = scalar_lea.vmem %s45_s19, 3072  ;;  %p1066_p6 = scmp.lt.s32.totalorder %s45_s19, %s45_s19 }
  0x2b   :  { %p1062_p5 = scmp.ne.s32.totalorder %s45_s19, %s1061_s28  ;;  %p1067_p7 = scmp.lt.s32.totalorder %s1061_s28, %s1061_s28 }
  0x2d   :  { %p1068_p8 = por %p1067_p7, %p1066_p6 }
  0x2f   :  { %p1069_p9 = pnand %p1068_p8, %p1062_p5 }
  0x31   :  { %1072 = shalt.err (!%p1069_p9)
}
  0x32   :  { %50 = dma.hbm_to_vmem [thread:$0]  %s1251_s3, 3072, %s45_s19, [#allocation6], %s1103_s30, %s1103_s30, %s1104_s6  }
  0x33   :  { %1095 = dma.done.wait [#allocation3], 256  }
  0x34   :  { %1096 = vsyncadd [#allocation3], 4294967040 }
  0x35   :  { %1097 = dma.done.wait [#allocation6], 6144  }
  0x36   :  { %1098 = vsyncadd [#allocation6], 4294961152  ;;  %v955_v0 = vld [vmem:[#allocation5 + $0x40] sm:$0xff]   ;;  %v958_v3 = vld [vmem:[#allocation5 + $0x48] sm:$0xff]   ;;  %vm104_vm0 = vcmask 1047552   ;;  %vm93_vm2 = vcmask 1040384  }
  0x37   :  { %v956_v1 = vld [vmem:[#allocation5 + $0x80] sm:$0xff]   ;;  %831 = vmatprep.subr.bf16.mxu0 %v955_v0  ;;  %v959_v4 = vld [vmem:[#allocation5 + $0x88] sm:$0xff]   ;;  %v961_v6 = vld [vmem:[#allocation5 + $0x50] sm:$0xff]   ;;  %vm105_vm1 = vsmask.f32 7424 }
  0x38   :  { %v957_v2 = vld [vmem:[#allocation5] sm:$0xff]   ;;  %907 = vmatprep.subr.bf16.mxu1 %v956_v1  ;;  %v960_v5 = vld [vmem:[#allocation5 + $0x8] sm:$0xff]   ;;  %v962_v7 = vld [vmem:[#allocation5 + $0x90] sm:$0xff]   ;;  %vm94_vm3 = vsmask.f32 256 }
  0x39   :  { %832 = vmatpush3.bf16.msra.mxu0 %v957_v2  ;;  %908 = vmatpush3.bf16.msra.mxu1 %v956_v1  ;;  %v963_v8 = vld [vmem:[#allocation5 + $0x10] sm:$0xff]   ;;  %v964_v9 = vld [vmem:[#allocation5 + $0x58] sm:$0xff]   ;;  %v967_v12 = vld [vmem:[#allocation5 + $0x60] sm:$0xff]  }
  0x3a   :  { %833 = vmatprep.subr.bf16.mxu0 %v958_v3  ;;  %909 = vmatprep.subr.bf16.mxu1 %v959_v4  ;;  %v965_v10 = vld [vmem:[#allocation5 + $0x98] sm:$0xff]   ;;  %v968_v13 = vld [vmem:[#allocation5 + $0xa0] sm:$0xff]   ;;  %v970_v15 = vld [vmem:[#allocation5 + $0x68] sm:$0xff]  }
  0x3b   :  { %v966_v11 = vld [vmem:[#allocation5 + $0x18] sm:$0xff]   ;;  %v969_v14 = vld [vmem:[#allocation5 + $0x20] sm:$0xff]   ;;  %v971_v16 = vld [vmem:[#allocation5 + $0xa8] sm:$0xff]  }
  0x3c   :  { %v972_v17 = vld [vmem:[#allocation5 + $0x28] sm:$0xff]   ;;  %v973_v18 = vld [vmem:[#allocation5 + $0x70] sm:$0xff]   ;;  %v976_v21 = vld [vmem:[#allocation5 + $0x78] sm:$0xff]  }
  0x3d   :  { %834 = vmatpush3.bf16.msra.mxu0 %v960_v5  ;;  %910 = vmatpush3.bf16.msra.mxu1 %v959_v4  ;;  %v974_v19 = vld [vmem:[#allocation5 + $0xb0] sm:$0xff]   ;;  %v1193_v23 = vld [vmem:[#allocation2 + $0x8] sm:$0xff]   ;;  %vm1198_vm4 = vmand %vm104_vm0, %vm105_vm1 }
  0x3e   :  { %835 = vmatprep.subr.bf16.mxu0 %v961_v6  ;;  %911 = vmatprep.subr.bf16.mxu1 %v962_v7  ;;  %v975_v20 = vld [vmem:[#allocation5 + $0x30] sm:$0xff]   ;;  %v977_v24 = vld [vmem:[#allocation5 + $0xb8] sm:$0xff]   ;;  %v85_v28 = vshrl.u32 %v1193_v23, 16  ;;  %v88_v29 = vshll.u32 %v1193_v23, 16  ;;  %vm1205_vm5 = vmand %vm93_vm2, %vm94_vm3 }
  0x3f   :  { %v1191_v22 = vld [vmem:[#allocation2] sm:$0xff]   ;;  %v978_v30 = vld [vmem:[#allocation5 + $0x38] sm:$0xff]   ;;  %v981_v36 = vld [vmem:[#allocation7 + $0x40] sm:$0xff]  }
  0x40   :  { %335 = vmatprep.mubr.bf16.mxu0 %v1191_v22  ;;  %v78_v25 = vshrl.u32 %v1191_v22, 16  ;;  %v81_v26 = vshll.u32 %v1191_v22, 16  ;;  %v100_v34 = vrot.slane %v88_v29, 1  ;;  %v87_v35 = vrot.slane %v85_v28, 7  ;;  %v982_v37 = vld [vmem:[#allocation7] sm:$0xff]   ;;  %v983_v43 = vld [vmem:[#allocation7 + $0x48] sm:$0xff]  }
  0x41   :  { %836 = vmatpush3.bf16.msra.mxu0 %v963_v8  ;;  %912 = vmatpush3.bf16.msra.mxu1 %v962_v7  ;;  %v986_v42 = vld [vmem:[#allocation7 + $0x80] sm:$0xff]   ;;  %v984_v48 = vld [vmem:[#allocation7 + $0x8] sm:$0xff]   ;;  %v985_v49 = vld [vmem:[#allocation7 + $0x50] sm:$0xff]  }
  0x42   :  { %837 = vmatprep.subr.bf16.mxu0 %v964_v9  ;;  %913 = vmatprep.subr.bf16.mxu1 %v965_v10  ;;  %v98_v31 = vrot.slane %v81_v26, 1  ;;  %v80_v32 = vrot.slane %v78_v25, 7  ;;  %v101_v40 = vor.u32 %v100_v34, %v85_v28  ;;  %v90_v41 = vor.u32 %v88_v29, %v87_v35  ;;  %v987_v50 = vld [vmem:[#allocation7 + $0x10] sm:$0xff]   ;;  %v988_v51 = vld [vmem:[#allocation7 + $0x58] sm:$0xff]   ;;  %v989_v52 = vld [vmem:[#allocation7 + $0x88] sm:$0xff]  }
  0x43   :  { %v990_v53 = vld [vmem:[#allocation7 + $0x18] sm:$0xff]   ;;  %v991_v54 = vld [vmem:[#allocation7 + $0x60] sm:$0xff]   ;;  %v992_v55 = vld [vmem:[#allocation7 + $0x90] sm:$0xff]  }
  0x44   :  { %v99_v38 = vor.u32 %v98_v31, %v78_v25  ;;  %v83_v39 = vor.u32 %v81_v26, %v80_v32  ;;  %v108_v46 = vsel %vm1198_vm4, %v101_v40, 0  ;;  %v97_v47 = vsel %vm1205_vm5, 0, %v90_v41  ;;  %v993_v56 = vld [vmem:[#allocation7 + $0x20] sm:$0xff]   ;;  %v994_v57 = vld [vmem:[#allocation7 + $0x68] sm:$0xff]   ;;  %v995_v58 = vld [vmem:[#allocation7 + $0x98] sm:$0xff]  }
  0x45   :  { %838 = vmatpush3.bf16.msra.mxu0 %v966_v11  ;;  %914 = vmatpush3.bf16.msra.mxu1 %v965_v10  ;;  %v996_v59 = vld [vmem:[#allocation7 + $0x28] sm:$0xff]   ;;  %v997_v60 = vld [vmem:[#allocation7 + $0x70] sm:$0xff]   ;;  %v998_v61 = vld [vmem:[#allocation7 + $0xa0] sm:$0xff]  }
  0x46   :  { %839 = vmatprep.subr.bf16.mxu0 %v967_v12  ;;  %915 = vmatprep.subr.bf16.mxu1 %v968_v13  ;;  %v107_v44 = vsel %vm1198_vm4, %v99_v38, 0  ;;  %v96_v45 = vsel %vm1205_vm5, 0, %v83_v39  ;;  %v999_v62 = vld [vmem:[#allocation7 + $0x30] sm:$0xff]   ;;  %v1000_v63 = vld [vmem:[#allocation7 + $0x78] sm:$0xff]   ;;  %v1001_v0 = vld [vmem:[#allocation7 + $0xa8] sm:$0xff]  }
  0x47   :  { %923 = vmatprep.mubr.bf16.mxu1 %v107_v44  ;;  %v1002_v1 = vld [vmem:[#allocation7 + $0x38] sm:$0xff]   ;;  %v1003_v2 = vld [vmem:[#allocation7 + $0xb0] sm:$0xff]  }
  0x48   :  { %v1004_v3 = vld [vmem:[#allocation7 + $0xb8] sm:$0xff]   ;;  %v805_v11 = vld [vmem:[%s1250_s2] ss:$0 sm:$0xff] }
  0x49   :  { %840 = vmatpush3.bf16.msra.mxu0 %v969_v14  ;;  %916 = vmatpush3.bf16.msra.mxu1 %v968_v13 }
  0x4a   :  { %841 = vmatprep.subr.bf16.mxu0 %v970_v15  ;;  %917 = vmatprep.subr.bf16.mxu1 %v971_v16 }
  0x4d   :  { %842 = vmatpush3.bf16.msra.mxu0 %v972_v17  ;;  %918 = vmatpush3.bf16.msra.mxu1 %v971_v16 }
  0x4e   :  { %843 = vmatprep.subr.bf16.mxu0 %v973_v18  ;;  %919 = vmatprep.subr.bf16.mxu1 %v974_v19 }
  0x51   :  { %844 = vmatpush3.bf16.msra.mxu0 %v975_v20  ;;  %920 = vmatpush3.bf16.msra.mxu1 %v974_v19 }
  0x52   :  { %845 = vmatprep.subr.bf16.mxu0 %v976_v21  ;;  %921 = vmatprep.subr.bf16.mxu1 %v977_v24 }
  0x55   :  { %846 = vmatpush3.bf16.msra.mxu0 %v978_v30  ;;  %922 = vmatpush3.bf16.msra.mxu1 %v977_v24 }
  0x56   :  { %869 = vmatprep.subr.bf16.mxu0 %v981_v36  ;;  %927 = vmatprep.subr.bf16.mxu1 %v986_v42 }
  0x58   :  { %336 = vmatmul.mubr.bf16.vlgmr.msra.gmra.mrb[0].mxu0 %v96_v45  ;;  %924 = vmatmul.mubr.bf16.vlgmr.msra.gmra.mrb[0].mxu1 %v108_v46 }
  0x59   :  { %343 = vmatprep.mubr.bf16.mxu0 %v1193_v23  ;;  %870 = vmatpush3.bf16.msra.mxu0 %v982_v37 }
  0x5a   :  { %871 = vmatprep.subr.bf16.mxu0 %v983_v43  ;;  %928 = vmatpush3.bf16.msra.mxu1 %v986_v42 }
  0x5b   :  { %929 = vmatprep.subr.bf16.mxu1 %v989_v52 }
  0x5d   :  { %872 = vmatpush3.bf16.msra.mxu0 %v984_v48 }
  0x5e   :  { %873 = vmatprep.subr.bf16.mxu0 %v985_v49  ;;  %930 = vmatpush3.bf16.msra.mxu1 %v989_v52 }
  0x5f   :  { %931 = vmatprep.subr.bf16.mxu1 %v992_v55 }
  0x60   :  { %344 = vmatmul.mubr.bf16.gmra.mrb[4].mxu0 %v97_v47 }
  0x61   :  { %874 = vmatpush3.bf16.msra.mxu0 %v987_v50 }
  0x62   :  { %875 = vmatprep.subr.bf16.mxu0 %v988_v51  ;;  %932 = vmatpush3.bf16.msra.mxu1 %v992_v55 }
  0x63   :  { %933 = vmatprep.subr.bf16.mxu1 %v995_v58 }
  0x65   :  { %876 = vmatpush3.bf16.msra.mxu0 %v990_v53 }
  0x66   :  { %877 = vmatprep.subr.bf16.mxu0 %v991_v54  ;;  %934 = vmatpush3.bf16.msra.mxu1 %v995_v58 }
  0x67   :  { %935 = vmatprep.subr.bf16.mxu1 %v998_v61 }
  0x69   :  { %878 = vmatpush3.bf16.msra.mxu0 %v993_v56 }
  0x6a   :  { %879 = vmatprep.subr.bf16.mxu0 %v994_v57  ;;  %936 = vmatpush3.bf16.msra.mxu1 %v998_v61 }
  0x6b   :  { %937 = vmatprep.subr.bf16.mxu1 %v1001_v0 }
  0x6d   :  { %880 = vmatpush3.bf16.msra.mxu0 %v996_v59 }
  0x6e   :  { %881 = vmatprep.subr.bf16.mxu0 %v997_v60  ;;  %938 = vmatpush3.bf16.msra.mxu1 %v1001_v0  ;;  %v830_v0 = vld [vmem:[%s1252_s4] ss:$0 sm:$0xff]  ;;  %s1106_s4 = smov [#allocation8]  }
  0x6f   :  { %939 = vmatprep.subr.bf16.mxu1 %v1003_v2  ;;  %s766_s6 = sshll.u32 %s1106_s4, 4  ;;  %s767_s6 = int_to_ptr.vmem [resolvable:$true] %s766_s6 }
  0x70   :  { %s1073_s7 = scalar_lea.vmem %s767_s6, 512  ;;  %p1078_p11 = scmp.lt.s32.totalorder %s767_s6, %s767_s6 }
  0x71   :  { %882 = vmatpush3.bf16.msra.mxu0 %v999_v62  ;;  %p1074_p10 = scmp.ne.s32.totalorder %s767_s6, %s1073_s7  ;;  %p1079_p12 = scmp.lt.s32.totalorder %s1073_s7, %s1073_s7 }
  0x72   :  { %883 = vmatprep.subr.bf16.mxu0 %v1000_v63  ;;  %940 = vmatpush3.bf16.msra.mxu1 %v1003_v2 }
  0x73   :  { %941 = vmatprep.subr.bf16.mxu1 %v1004_v3  ;;  %p1080_p13 = por %p1079_p12, %p1078_p11 }
  0x75   :  { %884 = vmatpush3.bf16.msra.mxu0 %v1002_v1  ;;  %v745_v1 = vunpack.c.l.bf16 %v1191_v22  ;;  %p1081_p0 = pnand %p1080_p13, %p1074_p10 }
  0x76   :  { %942 = vmatpush3.bf16.msra.mxu1 %v1004_v3 }
 0x12b   :  { %v847_v4 = vpop.f32.mrb[0].mxu0  ;;  %v925_v5 = vpop.f32.mrb[0].mxu1 }
 0x12c   :  { %v848_v6 = vpop.f32.mrb[1].mxu0  ;;  %v386_v7 = vpop.f32.mrb[1].mxu1 }
 0x12d   :  { %v849_v8 = vadd.f32 %v848_v6, %v847_v4  ;;  %v850_v9 = vpop.f32.mrb[2].mxu0  ;;  %v926_v10 = vpop.f32.mrb[2].mxu1  ;;  %v747_v6 = vunpack.c.l.bf16 %v1193_v23 }
 0x12e   :  { %v851_v12 = vpop.f32.mrb[3].mxu0  ;;  %v389_v13 = vpop.f32.mrb[3].mxu1 }
 0x12f   :  { %v387_v14 = vadd.f32 %v849_v8, %v386_v7  ;;  %v852_v15 = vadd.f32 %v851_v12, %v850_v9 }
 0x131   :  { %v408_v16 = vadd.f32 %v805_v11, %v387_v14  ;;  %v390_v17 = vadd.f32 %v852_v15, %v389_v13  ;;  %v748_v13 = vunpack.c.h.bf16 %v1193_v23 }
 0x133   :  { %v409_v18 = vadd.f32 %v805_v11, %v390_v17  ;;  %v853_v19 = vpop.f32.mrb[4].mxu0  ;;  %v412_v21 = vmax.f32 %v408_v16, 0.0 }
 0x134   :  { %v854_v20 = vpop.f32.mrb[5].mxu0 }
 0x135   :  { %v413_v24 = vmax.f32 %v409_v18, 0.0  ;;  %v855_v25 = vadd.f32 %v854_v20, %v853_v19  ;;  %v856_v26 = vpop.f32.mrb[6].mxu0 }
 0x136   :  { %v857_v28 = vpop.f32.mrb[7].mxu0 }
 0x137   :  { %v395_v29 = vadd.f32 %v925_v5, %v855_v25  ;;  %v858_v30 = vadd.f32 %v857_v28, %v856_v26  ;;  %v416_v31 = vpack.c.bf16 %v413_v24, %v412_v21  ;;  %v746_v5 = vunpack.c.h.bf16 %v1191_v22 }
 0x139   :  { %v410_v32 = vadd.f32 %v805_v11, %v395_v29  ;;  %v398_v34 = vadd.f32 %v926_v10, %v858_v30  ;;  %v419_v35 = vshrl.u32 %v416_v31, 16  ;;  %v422_v36 = vshll.u32 %v416_v31, 16  ;;  %668 = vmatprep.mubr.bf16.mxu0 %v416_v31 }
 0x13b   :  { %v411_v37 = vadd.f32 %v805_v11, %v398_v34  ;;  %v421_v38 = vrot.slane %v419_v35, 7  ;;  %v436_v39 = vrot.slane %v422_v36, 1  ;;  %v414_v40 = vmax.f32 %v410_v32, 0.0 }
 0x13d   :  { %v415_v41 = vmax.f32 %v411_v37, 0.0  ;;  %v424_v42 = vor.u32 %v422_v36, %v421_v38  ;;  %v437_v43 = vor.u32 %v436_v39, %v419_v35 }
 0x13f   :  { %v434_v44 = vsel %vm1205_vm5, 0, %v424_v42  ;;  %v442_v45 = vsel %vm1198_vm4, %v437_v43, 0  ;;  %v417_v46 = vpack.c.bf16 %v415_v41, %v414_v40 }
 0x140   :  { %669 = vmatmul.mubr.bf16.vlgmr.msra.gmra.mrb[8].mxu0 %v434_v44  ;;  %943 = vmatprep.mubr.bf16.mxu1 %v442_v45 }
 0x141   :  { %676 = vmatprep.mubr.bf16.mxu0 %v417_v46  ;;  %v426_v47 = vshrl.u32 %v417_v46, 16  ;;  %v429_v48 = vshll.u32 %v417_v46, 16 }
 0x143   :  { %v428_v49 = vrot.slane %v426_v47, 7  ;;  %v438_v50 = vrot.slane %v429_v48, 1 }
 0x145   :  { %v431_v51 = vor.u32 %v429_v48, %v428_v49  ;;  %v439_v52 = vor.u32 %v438_v50, %v426_v47 }
 0x147   :  { %v435_v53 = vsel %vm1205_vm5, 0, %v431_v51  ;;  %v443_v54 = vsel %vm1198_vm4, %v439_v52, 0 }
 0x148   :  { %677 = vmatmul.mubr.bf16.gmra.mrb[12].mxu0 %v435_v53  ;;  %944 = vmatmul.mubr.bf16.vlgmr.msra.gmra.mrb[4].mxu1 %v443_v54 }
 0x213   :  { %v885_v55 = vpop.f32.mrb[8].mxu0 }
 0x214   :  { %v886_v56 = vpop.f32.mrb[9].mxu0 }
 0x215   :  { %v887_v57 = vadd.f32 %v886_v56, %v885_v55  ;;  %v888_v58 = vpop.f32.mrb[10].mxu0 }
 0x216   :  { %v889_v59 = vpop.f32.mrb[11].mxu0 }
 0x217   :  { %v890_v60 = vadd.f32 %v889_v59, %v888_v58 }
 0x21b   :  { %v891_v61 = vpop.f32.mrb[12].mxu0  ;;  %v945_v62 = vpop.f32.mrb[4].mxu1 }
 0x21c   :  { %v892_v63 = vpop.f32.mrb[13].mxu0  ;;  %v719_v33 = vpop.f32.mrb[5].mxu1 }
 0x21d   :  { %v893_v27 = vadd.f32 %v892_v63, %v891_v61  ;;  %v720_v2 = vadd.f32 %v887_v57, %v719_v33  ;;  %v894_v3 = vpop.f32.mrb[14].mxu0  ;;  %v946_v4 = vpop.f32.mrb[6].mxu1 }
 0x21e   :  { %v895_v7 = vpop.f32.mrb[15].mxu0  ;;  %v722_v8 = vpop.f32.mrb[7].mxu1 }
 0x21f   :  { %v728_v9 = vadd.f32 %v945_v62, %v893_v27  ;;  %v741_v10 = vadd.f32 %v830_v0, %v720_v2  ;;  %v896_v11 = vadd.f32 %v895_v7, %v894_v3  ;;  %v723_v12 = vadd.f32 %v890_v60, %v722_v8 }
 0x221   :  { %v743_v14 = vadd.f32 %v830_v0, %v728_v9  ;;  %v749_v15 = vadd.f32 %v745_v1, %v741_v10  ;;  %v731_v16 = vadd.f32 %v946_v4, %v896_v11  ;;  %v742_v17 = vadd.f32 %v830_v0, %v723_v12 }
 0x223   :  { %v751_v18 = vadd.f32 %v747_v6, %v743_v14  ;;  %v753_v19 = vmax.f32 %v749_v15, 0.0  ;;  %v744_v20 = vadd.f32 %v830_v0, %v731_v16  ;;  %v750_v21 = vadd.f32 %v746_v5, %v742_v17 }
 0x225   :  { %v755_v22 = vmax.f32 %v751_v18, 0.0  ;;  %757 = vst [vmem:[#allocation8] sm:$0xff] %v753_v19  ;;  %v752_v24 = vadd.f32 %v748_v13, %v744_v20  ;;  %v754_v25 = vmax.f32 %v750_v21, 0.0 }
 0x227   :  { %759 = vst [vmem:[#allocation8 + $0x10] sm:$0xff] %v755_v22  ;;  %v756_v26 = vmax.f32 %v752_v24, 0.0  ;;  %758 = vst [vmem:[#allocation8 + $0x8] sm:$0xff] %v754_v25 }
 0x229   :  { %760 = vst [vmem:[#allocation8 + $0x18] sm:$0xff] %v756_v26 }
 0x22a   :  { %1084 = shalt.err (!%p1081_p0)
}
 0x22b   :  { %s1085_s10 = scalar_lea.hbm %s1253_s5, 512 }
 0x22c   :  { %p1086_p1 = scmp.ne.s32.totalorder %s1253_s5, %s1085_s10  ;;  %p1089_p2 = scmp.lt.u32.totalorder %s1085_s10, %s1253_s5 }
 0x22e   :  { %p1091_p3 = pnand %p1089_p2, %p1086_p1 }
 0x230   :  { %1094 = shalt.err (!%p1091_p3)
}
 0x231   :  { %s1107_s15 = smov 128   ;;  %s1108_s16 = smov 8  }
 0x232   :  { %772 = dma.vmem_to_hbm [thread:$0]  %s767_s6, 512, %s1253_s5, [#allocation4], %s1107_s15, %s1107_s15, %s1108_s16  }
 0x233   :  { %1099 = dma.done.wait [#allocation4], 512  }
 0x234   :  { %1100 = vsyncadd [#allocation4], 4294966784 }
 0x235   :  { %776 = vsyncpa [#allocation3], 1 }
 0x236   :  { %777 = vsyncpa [#allocation6], 1 }
 0x237   :  { %778 = vsyncpa [#allocation4], 1 }

</bundles_post_ra>
